<compile_context>
chip_gen: v7x
topology: tpu7x:2x2x1
jax: 0.10.0
libtpu: 0.0.40
codegen_flags: <defaults>
</compile_context>

<pallas_src>
import functools

import jax
import jax.numpy as jnp
from jax.experimental import pallas as pl
from jax.experimental.pallas import tpu as pltpu

_LANES = 128


def _dice_kernel(pred_ref, target_ref, num_ref, den_ref, *,
                 p, rows_tile, r_bulk, nk_total, nk_per, needs_tail_mask):
    """Accumulate per-batch partial num/den over one (rows_tile, 128) tile."""
    k = pl.program_id(2)

    @pl.when(k == 0)
    def _():
        num_ref[...] = jnp.zeros_like(num_ref)
        den_ref[...] = jnp.zeros_like(den_ref)

    pr = pred_ref[...].astype(jnp.float32)     # (rows_tile, 128)
    tg = target_ref[...].astype(jnp.float32)

    prod = pr * tg
    if p == 2:
        den_t = pr * pr + tg * tg
    elif p == 1:
        den_t = pr + tg
    else:
        den_t = pr ** p + tg ** p

    def _accumulate(num_t, den_tt):
        if rows_tile % 8 == 0 and rows_tile > 8:
            # Pure cross-vreg VPU adds; no cross-lane reduce in the hot loop.
            g = rows_tile // 8
            num_ref[...] += num_t.reshape(g, 8, _LANES).sum(axis=0)
            den_ref[...] += den_tt.reshape(g, 8, _LANES).sum(axis=0)
        else:
            num_ref[...] += num_t
            den_ref[...] += den_tt

    if not needs_tail_mask:
        _accumulate(prod, den_t)
    else:
        s = pl.program_id(1)
        t = s * nk_per + k                      # global row-tile index

        @pl.when(t < nk_total - 1)              # interior tile: unmasked
        def _():
            _accumulate(prod, den_t)

        @pl.when(t >= nk_total - 1)             # ragged / out-of-range tile
        def _():
            valid_rows = r_bulk - t * rows_tile  # may be <= 0 (fully OOB tile)
            rows = jax.lax.broadcasted_iota(jnp.int32, prod.shape, 0)
            valid = rows < valid_rows
            _accumulate(jnp.where(valid, prod, 0.0),
                        jnp.where(valid, den_t, 0.0))


def _device_params():
    try:
        kind = jax.devices()[0].device_kind.lower()
    except Exception:
        kind = ""
    is_v7 = "v7" in kind
    # ~4 MiB blocks / 48 MiB scoped VMEM on v7x (64 MiB physical per TC);
    # ~8 MiB blocks / 64 MiB scoped VMEM on v5e/v6e (128 MiB physical).
    block_bytes = (4 if is_v7 else 8) * 1024 * 1024
    vmem_limit = (48 if is_v7 else 64) * 1024 * 1024
    return is_v7, block_bytes, vmem_limit


def _bulk_num_den(pred2d, target2d, n, d_bulk, r_bulk, p, block_rows, n_split):
    """Per-batch (num, den) partial sums over the lane-aligned bulk columns."""
    d = pred2d.shape[1]
    if d_bulk != d:
        # Ragged D: run the kernel on the lane-aligned bulk only; the caller
        # adds the <128-element tail.  (One small XLA slice pass; no padding,
        # no per-element lane masking inside the kernel.)
        pred2d = pred2d[:, :d_bulk]
        target2d = target2d[:, :d_bulk]
    pred3d = pred2d.reshape(n, r_bulk, _LANES)
    target3d = target2d.reshape(n, r_bulk, _LANES)

    is_v7, block_bytes, vmem_limit = _device_params()
    itemsize = max(jnp.dtype(pred2d.dtype).itemsize,
                   jnp.dtype(target2d.dtype).itemsize)

    if block_rows is None:
        rows_target = max(8, block_bytes // (_LANES * itemsize))
    else:
        rows_target = block_rows
    if r_bulk >= 8:
        rows_tile = max(8, (min(rows_target, (r_bulk // 8) * 8) // 8) * 8)
    else:
        rows_tile = r_bulk                      # block equals the full dim
    nk_total = -(-r_bulk // rows_tile)

    if n_split is None:
        # v7x small-batch: split the reduction axis across the two TensorCores.
        n_split = 2 if (is_v7 and n < 4 and nk_total >= 2) else 1
    n_split = max(1, min(int(n_split), nk_total))
    nk_per = -(-nk_total // n_split)

    needs_tail_mask = (r_bulk % rows_tile != 0) or (n_split * nk_per != nk_total)
    acc_rows = 8 if rows_tile % 8 == 0 else rows_tile
    last_tile = nk_total - 1

    kernel = functools.partial(
        _dice_kernel, p=p, rows_tile=rows_tile, r_bulk=r_bulk,
        nk_total=nk_total, nk_per=nk_per, needs_tail_mask=needs_tail_mask)

    if n_split == 1:
        in_map = lambda b, s, k: (b, k, 0)
    else:
        # Clamp out-of-range split tiles onto the last real tile; their rows
        # are fully masked in-kernel so they contribute zero.
        in_map = lambda b, s, k: (b, jnp.minimum(s * nk_per + k, last_tile), 0)
    out_map = lambda b, s, k: (b * n_split + s, 0, 0)

    out_sds = jax.ShapeDtypeStruct((n * n_split, acc_rows, _LANES), jnp.float32)

    num_p, den_p = pl.pallas_call(
        kernel,
        out_shape=(out_sds, out_sds),
        grid_spec=pltpu.PrefetchScalarGridSpec(
            num_scalar_prefetch=0,
            grid=(n, n_split, nk_per),
            in_specs=[
                pl.BlockSpec((None, rows_tile, _LANES), in_map),
                pl.BlockSpec((None, rows_tile, _LANES), in_map),
            ],
            out_specs=(
                pl.BlockSpec((None, acc_rows, _LANES), out_map),
                pl.BlockSpec((None, acc_rows, _LANES), out_map),
            ),
        ),
        compiler_params=pltpu.CompilerParams(
            dimension_semantics=("parallel", "parallel", "arbitrary"),
            vmem_limit_bytes=vmem_limit),
    )(pred3d, target3d)

    num = num_p.reshape(n, -1).sum(axis=1)
    den = den_p.reshape(n, -1).sum(axis=1)
    return num, den


def binary_dice_loss(pred, target, *, smooth=1, p=2, reduction='mean',
                     block_rows=None, n_split=None):
    """Forward pass of BinaryDiceLoss (same semantics as the PyTorch module)."""
    assert pred.shape[0] == target.shape[0]
    n = pred.shape[0]
    pred2d = pred.reshape(n, -1)
    target2d = target.reshape(n, -1)
    d = pred2d.shape[1]

    r_bulk = d // _LANES
    d_bulk = r_bulk * _LANES
    smooth = float(smooth)

    if r_bulk > 0:
        num, den = _bulk_num_den(pred2d, target2d, n, d_bulk, r_bulk, p,
                                 block_rows, n_split)
    else:
        num = jnp.zeros((n,), jnp.float32)
        den = jnp.zeros((n,), jnp.float32)

    if d_bulk < d:
        # <128-element per-batch tail: trivial JAX work; keeps the kernel hot
        # loop free of padding and lane masks.
        pr_t = pred2d[:, d_bulk:].astype(jnp.float32)
        tg_t = target2d[:, d_bulk:].astype(jnp.float32)
        num = num + jnp.sum(pr_t * tg_t, axis=1)
        if p == 2:
            den = den + jnp.sum(pr_t * pr_t + tg_t * tg_t, axis=1)
        elif p == 1:
            den = den + jnp.sum(pr_t + tg_t, axis=1)
        else:
            den = den + jnp.sum(pr_t ** p + tg_t ** p, axis=1)

    loss = 1.0 - (2.0 * num + smooth) / (den + smooth)
    if reduction == 'mean':
        return jnp.mean(loss)
    if reduction == 'sum':
        return jnp.sum(loss)
    if reduction == 'none':
        return loss
    raise ValueError('reduction is not support')


def _reference(pred, target, smooth=1, p=2, reduction='mean'):
    n = pred.shape[0]
    pr = pred.reshape(n, -1).astype(jnp.float32)
    tg = target.reshape(n, -1).astype(jnp.float32)
    num = 2 * jnp.sum(pr * tg, axis=1) + smooth
    den = jnp.sum(pr ** p + tg ** p, axis=1) + smooth
    loss = 1 - num / den
    if reduction == 'mean':
        return loss.mean()
    if reduction == 'sum':
        return loss.sum()
    return loss


if __name__ == "__main__":
    key = jax.random.PRNGKey(0)
    k1, k2, k3, k4, k5, k6 = jax.random.split(key, 6)

    # Test 1: NCHW f32, D = 1024 (multiple of 128, no tail, no mask), 'mean'.
    pred = jax.nn.sigmoid(jax.random.normal(k1, (2, 4, 16, 16), jnp.float32))
    target = (jax.random.uniform(k2, (2, 4, 16, 16)) > 0.5).astype(jnp.float32)
    out = jax.block_until_ready(binary_dice_loss(pred, target, smooth=1, p=2,
                                                 reduction='mean'))
    ref = _reference(pred, target)
    assert jnp.allclose(out, ref, atol=1e-5, rtol=1e-5), (out, ref)

    # Test 2: ragged D (231 = 128 + 103): wrapper-side tail correction, 'none'.
    pred2 = jax.nn.sigmoid(jax.random.normal(k3, (3, 3, 7, 11), jnp.float32))
    target2 = (jax.random.uniform(k4, (3, 3, 7, 11)) > 0.5).astype(jnp.float32)
    out2 = jax.block_until_ready(binary_dice_loss(pred2, target2,
                                                  reduction='none'))
    ref2 = _reference(pred2, target2, reduction='none')
    assert jnp.allclose(out2, ref2, atol=1e-5, rtol=1e-5), (out2, ref2)

    # Test 3: bf16 inputs, D = 2560 (r=20 rows) with block_rows=8 -> ragged
    # last tile, plus a forced 2-way reduction-axis split (exercises the
    # masked tail tile, the fully-OOB clamped tile and the v7x split path).
    pred3 = jax.nn.sigmoid(
        jax.random.normal(k5, (2, 2560), jnp.float32)).astype(jnp.bfloat16)
    target3 = (jax.random.uniform(k6, (2, 2560)) > 0.5).astype(jnp.bfloat16)
    out3 = jax.block_until_ready(binary_dice_loss(pred3, target3,
                                                  reduction='sum',
                                                  block_rows=8, n_split=2))
    ref3 = _reference(pred3, target3, reduction='sum')
    assert jnp.allclose(out3, ref3, atol=1e-3, rtol=1e-3), (out3, ref3)

    print("KERNEL_OK")
</pallas_src>

<mosaic_0001>
module attributes {stable_mosaic.version = 11 : i64} {
  func.func @_dice_kernel(%arg0: i32, %arg1: i32, %arg2: i32, %arg3: memref<1x8x128xf32, #tpu.memory_space<vmem>>, %arg4: memref<1x8x128xf32, #tpu.memory_space<vmem>>, %arg5: memref<1x8x128xf32, #tpu.memory_space<vmem>>, %arg6: memref<1x8x128xf32, #tpu.memory_space<vmem>>) attributes {dimension_semantics = [#tpu.dimension_semantics<parallel>, #tpu.dimension_semantics<parallel>, #tpu.dimension_semantics<arbitrary>], iteration_bounds = array<i64: 2, 1, 1>, scalar_prefetch = 0 : i64, scratch_operands = 0 : i64, tpu.core_type = #tpu.core_type<tc>, window_params = [{transform_indices = @transform_0, window_bounds = array<i64: 1, 8, 128>}, {transform_indices = @transform_1, window_bounds = array<i64: 1, 8, 128>}, {transform_indices = @transform_2, window_bounds = array<i64: 1, 8, 128>}, {transform_indices = @transform_3, window_bounds = array<i64: 1, 8, 128>}]} {
    %c0_i32 = arith.constant 0 : i32
    %0 = arith.cmpi eq, %arg2, %c0_i32 : i32
    %1 = arith.extui %0 : i1 to i32
    %c0_i32_0 = arith.constant 0 : i32
    %2 = arith.cmpi ne, %1, %c0_i32_0 : i32
    scf.if %2 {
      %cst = arith.constant 0.000000e+00 : f32
      %23 = vector.broadcast %cst : f32 to vector<8x128xf32>
      %c0_18 = arith.constant 0 : index
      %c0_19 = arith.constant 0 : index
      %c0_20 = arith.constant 0 : index
      %24 = vector.load %arg5[%c0_18, %c0_19, %c0_20] : memref<1x8x128xf32, #tpu.memory_space<vmem>>, vector<1x8x128xf32>
      %25 = vector.shape_cast %24 : vector<1x8x128xf32> to vector<8x128xf32>
      %26 = vector.shape_cast %23 : vector<8x128xf32> to vector<1x8x128xf32>
      tpu.vector_store %arg5[%c0_18, %c0_19, %c0_20], %26 {strides = array<i32>} : memref<1x8x128xf32, #tpu.memory_space<vmem>>, vector<1x8x128xf32>,
      %cst_21 = arith.constant 0.000000e+00 : f32
      %27 = vector.broadcast %cst_21 : f32 to vector<8x128xf32>
      %c0_22 = arith.constant 0 : index
      %c0_23 = arith.constant 0 : index
      %c0_24 = arith.constant 0 : index
      %28 = vector.load %arg6[%c0_22, %c0_23, %c0_24] : memref<1x8x128xf32, #tpu.memory_space<vmem>>, vector<1x8x128xf32>
      %29 = vector.shape_cast %28 : vector<1x8x128xf32> to vector<8x128xf32>
      %30 = vector.shape_cast %27 : vector<8x128xf32> to vector<1x8x128xf32>
      tpu.vector_store %arg6[%c0_22, %c0_23, %c0_24], %30 {strides = array<i32>} : memref<1x8x128xf32, #tpu.memory_space<vmem>>, vector<1x8x128xf32>,
    } else {
    }
    %c0 = arith.constant 0 : index
    %c0_1 = arith.constant 0 : index
    %c0_2 = arith.constant 0 : index
    %3 = vector.load %arg3[%c0, %c0_1, %c0_2] : memref<1x8x128xf32, #tpu.memory_space<vmem>>, vector<1x8x128xf32>
    %4 = vector.shape_cast %3 : vector<1x8x128xf32> to vector<8x128xf32>
    %c0_3 = arith.constant 0 : index
    %c0_4 = arith.constant 0 : index
    %c0_5 = arith.constant 0 : index
    %5 = vector.load %arg4[%c0_3, %c0_4, %c0_5] : memref<1x8x128xf32, #tpu.memory_space<vmem>>, vector<1x8x128xf32>
    %6 = vector.shape_cast %5 : vector<1x8x128xf32> to vector<8x128xf32>
    %7 = arith.mulf %4, %6 : vector<8x128xf32>
    %8 = arith.mulf %4, %4 : vector<8x128xf32>
    %9 = arith.mulf %6, %6 : vector<8x128xf32>
    %10 = arith.addf %8, %9 : vector<8x128xf32>
    %c0_6 = arith.constant 0 : index
    %c0_7 = arith.constant 0 : index
    %c0_8 = arith.constant 0 : index
    %11 = vector.load %arg5[%c0_6, %c0_7, %c0_8] : memref<1x8x128xf32, #tpu.memory_space<vmem>>, vector<1x8x128xf32>
    %12 = vector.shape_cast %11 : vector<1x8x128xf32> to vector<8x128xf32>
    %13 = arith.addf %12, %7 : vector<8x128xf32>
    %c0_9 = arith.constant 0 : index
    %c0_10 = arith.constant 0 : index
    %c0_11 = arith.constant 0 : index
    %14 = vector.load %arg5[%c0_9, %c0_10, %c0_11] : memref<1x8x128xf32, #tpu.memory_space<vmem>>, vector<1x8x128xf32>
    %15 = vector.shape_cast %14 : vector<1x8x128xf32> to vector<8x128xf32>
    %16 = vector.shape_cast %13 : vector<8x128xf32> to vector<1x8x128xf32>
    tpu.vector_store %arg5[%c0_9, %c0_10, %c0_11], %16 {strides = array<i32>} : memref<1x8x128xf32, #tpu.memory_space<vmem>>, vector<1x8x128xf32>,
    %c0_12 = arith.constant 0 : index
    %c0_13 = arith.constant 0 : index
    %c0_14 = arith.constant 0 : index
    %17 = vector.load %arg6[%c0_12, %c0_13, %c0_14] : memref<1x8x128xf32, #tpu.memory_space<vmem>>, vector<1x8x128xf32>
    %18 = vector.shape_cast %17 : vector<1x8x128xf32> to vector<8x128xf32>
    %19 = arith.addf %18, %10 : vector<8x128xf32>
    %c0_15 = arith.constant 0 : index
    %c0_16 = arith.constant 0 : index
    %c0_17 = arith.constant 0 : index
    %20 = vector.load %arg6[%c0_15, %c0_16, %c0_17] : memref<1x8x128xf32, #tpu.memory_space<vmem>>, vector<1x8x128xf32>
    %21 = vector.shape_cast %20 : vector<1x8x128xf32> to vector<8x128xf32>
    %22 = vector.shape_cast %19 : vector<8x128xf32> to vector<1x8x128xf32>
    tpu.vector_store %arg6[%c0_15, %c0_16, %c0_17], %22 {strides = array<i32>} : memref<1x8x128xf32, #tpu.memory_space<vmem>>, vector<1x8x128xf32>,
    return
  }
  func.func @transform_0(%arg0: i32, %arg1: i32, %arg2: i32) -> (i32, i32, i32) {
    %c0_i32 = arith.constant 0 : i32
    %c0_i32_0 = arith.constant 0 : i32
    return %arg0, %arg2, %c0_i32 : i32, i32, i32
  }
  func.func @transform_1(%arg0: i32, %arg1: i32, %arg2: i32) -> (i32, i32, i32) {
    %c0_i32 = arith.constant 0 : i32
    %c0_i32_0 = arith.constant 0 : i32
    return %arg0, %arg2, %c0_i32 : i32, i32, i32
  }
  func.func @transform_2(%arg0: i32, %arg1: i32, %arg2: i32) -> (i32, i32, i32) {
    %c1_i32 = arith.constant 1 : i32
    %0 = arith.muli %arg0, %c1_i32 : i32
    %1 = arith.addi %0, %arg1 : i32
    %c0_i32 = arith.constant 0 : i32
    %c0_i32_0 = arith.constant 0 : i32
    %c0_i32_1 = arith.constant 0 : i32
    return %1, %c0_i32, %c0_i32_0 : i32, i32, i32
  }
  func.func @transform_3(%arg0: i32, %arg1: i32, %arg2: i32) -> (i32, i32, i32) {
    %c1_i32 = arith.constant 1 : i32
    %0 = arith.muli %arg0, %c1_i32 : i32
    %1 = arith.addi %0, %arg1 : i32
    %c0_i32 = arith.constant 0 : i32
    %c0_i32_0 = arith.constant 0 : i32
    %c0_i32_1 = arith.constant 0 : i32
    return %1, %c0_i32, %c0_i32_0 : i32, i32, i32
  }
}

</mosaic_0001>

<bundles_post_ra>
// kernel: tpu_custom_call.1
= control target key start
LH: loop header
LB: loop body
LE: loop exit
PB: predicated region body
PF: predicated region fallthrough
CT: control target
= control target key end

     0   :  { %9 = vsyncpa [#allocation3], 0  ;;  %s1012_s0 = inlined_call_operand.hbm [shape: f32[2,8,128], index: 0, kind: input, shape index: {}]   ;;  %s1013_s1 = inlined_call_operand.hbm [shape: f32[2,8,128], index: 1, kind: input, shape index: {}]   ;;  %s1014_s2 = inlined_call_operand.hbm [shape: f32[2,8,128], index: 2, kind: output, shape index: {0}]   ;;  %s1015_s3 = inlined_call_operand.hbm [shape: f32[2,8,128], index: 3, kind: output, shape index: {1}]  }
   0x1   :  { %11 = vsyncpa [#allocation3 + $0x1], 0 }
   0x2   :  { %12 = vsyncpa [#allocation6], 0 }
   0x3   :  { %14 = vsyncpa [#allocation6 + $0x1], 0 }
   0x4   :  { %15 = vsyncpa [#allocation4], 0 }
   0x5   :  { %17 = vsyncpa [#allocation4 + $0x1], 0 }
   0x6   :  { %18 = vsyncpa [#allocation9], 0 }
   0x7   :  { %20 = vsyncpa [#allocation9 + $0x1], 0  ;;  %s753_s12 = smov 0   ;;  %s755_s13 = smov 0  }
   0x8   :  { %s757_s14 = smov 0   ;;  %s759_s15 = smov 0  }
   0x9   :  { %s761_s16 = smov 0   ;;  %s763_s17 = smov 0  }
   0xa LB: > { %s457_s18 = sadd.s32 4294967295, %s727_s17   ;;  %s458_s19 = sadd.s32 4294967294, %s727_s17   ;;  %s727_s17 = sphi %s763_s17, %s26_s17   ;;  %s723_s16 = sphi %s761_s16, %s1035_s16   ;;  %s719_s15 = sphi %s759_s15, %s1034_s15   ;;  %s715_s14 = sphi %s757_s14, %s1033_s14   ;;  %s711_s13 = sphi %s755_s13, %s1032_s13   ;;  %s707_s12 = sphi %s753_s12, %s1031_s12  }
   0xb   : > { %s45_s20 = sadd.s32 1, %s723_s16  ;;  %s54_s21 = sadd.s32 1, %s715_s14 }
   0xc   : > { %p47_p0 = scmp.ge.s32.totalorder %s45_s20, 2  ;;  %p61_p1 = scmp.ne.s32.totalorder %s715_s14, %s711_s13 }
   0xd   : > { %p62_p2 = scmp.eq.s32.totalorder %s727_s17, 0  ;;  %p67_p3 = scmp.ne.s32.totalorder %s711_s13, %s707_s12 }
   0xe   : > { %s1037_s20 = smov (%p47_p0, %s45_s20), 0  ;;  %p68_p5 = scmp.eq.s32.totalorder %s457_s18, 0 }
   0xf   : > { %p794_p4 = por %p62_p2, %p61_p1  ;;  %s49_s23 = ssub.s32 %s723_s16, %s1037_s20 }
  0x10   : > { %p121_p6 = scmp.eq.s32.totalorder %s457_s18, 1  ;;  %p52_p7 = scmp.eq.s32.totalorder %s49_s23, 0 }
  0x11   : > { %p800_p8 = por %p68_p5, %p67_p3  ;;  %p127_p10 = scmp.eq.s32.totalorder %s458_s19, 1 }
  0x12   : > { %p804_p9 = por %p121_p6, %p61_p1  ;;  %p498_p13 = scmp.lt.s32.totalorder %s727_s17, 2 }
  0x13   : > { %s1019_s24 = scalar_select %p800_p8, 1, 0 }
  0x14   : > { %s1020_s25 = scalar_select %p804_p9, 1, 0 }
  0x15   : > { %s809_s26 = scalar_select %p52_p7, %s715_s14, %s54_s21  }
  0x16   : > { %p811_p11 = por %p127_p10, %p67_p3  ;;  %s818_s28 = sand.u32 1, %s715_s14  }
  0x17   : > { %s461_s29 = sshll.u32 %s818_s28, 3  ;;  %s462_s30 = sshll.u32 %s723_s16, 7 }
  0x18   : > { %s1021_s27 = scalar_select %p811_p11, 1, 0 }
  0x19   : > { %s827_s6 = scalar_lea.hbm %s1012_s0, %s462_s30  ;;  %s179_s7 = scalar_lea.vmem [#allocation2], %s461_s29 }
  0x1a   : > { %s187_s8 = sshll.u32 %s179_s7, 4  ;;  %p835_p0 = pnand %p498_p13, %p794_p4  ;;  %s831_s8 = int_to_ptr.vmem [resolvable:$true] %s187_s8 }
  0x1b   : > { %s176_s10 = scalar_lea.sflag [#allocation3], %s818_s28  ;;  %s549_s11 = scalar_lea.hbm %s827_s6, 128 }
  0x1c   : > { %p550_p3 = scmp.ne.s32.totalorder %s827_s6, %s549_s11  ;;  %p551_p5 = pneg %p835_p0 }
  0x1d   : > { %s554_s21 = scalar_lea.hbm %s1012_s0, 256  ;;  %p555_p4 = scmp.lt.u32.totalorder %s827_s6, %s1012_s0 }
  0x1e   : > { %p552_p6 = pnand %p551_p5, %p550_p3  ;;  %p556_p10 = scmp.lt.u32.totalorder %s554_s21, %s549_s11 }
  0x1f   : > { %p558_p12 = scmp.lt.u32.totalorder %s549_s11, %s827_s6 }
  0x20   : > { %p553_p7 = pneg %p552_p6  ;;  %p557_p13 = por %p556_p10, %p555_p4 }
  0x22   : > { %p559_p1 = por %p558_p12, %p557_p13 }
  0x24   : > { %p560_p2 = pnand %p559_p1, %p553_p7 }
  0x26   : > { %563 = shalt.err (!%p560_p2)
}
  0x27   : > { %s564_s4 = scalar_lea.vmem %s831_s8, 128  ;;  %s729_s5 = smov [#allocation2]  }
  0x28   : > { %p565_p3 = scmp.ne.s32.totalorder %s831_s8, %s564_s4  ;;  %s569_s7 = sshll.u32 %s729_s5, 4  ;;  %s570_s7 = int_to_ptr.vmem [resolvable:$false] %s569_s7 }
  0x29   : > { %s571_s18 = scalar_lea.vmem %s570_s7, 256  ;;  %p572_p9 = scmp.lt.s32.totalorder %s831_s8, %s570_s7 }
  0x2a   : > { %p567_p6 = pnand %p565_p3, %p551_p5  ;;  %p573_p4 = scmp.lt.s32.totalorder %s571_s18, %s564_s4 }
  0x2c   : > { %p568_p11 = pneg %p567_p6  ;;  %p574_p10 = por %p573_p4, %p572_p9 }
  0x2e   : > { %p575_p12 = pnand %p574_p10, %p568_p11 }
  0x30   : > { %578 = shalt.err (!%p575_p12)
}
  0x31   : > { %487 = dma.hbm_to_vmem [thread:$0]  (!%p835_p0), %s827_s6, 128, %s831_s8, %s176_s10  }
  0x32   : > { %p1023_p1 = scmp.lt.s32.totalorder %s727_s17, 3  ;;  %p1024_p2 = scmp.ge.s32.totalorder %s727_s17, 1 }
  0x33   : > { %s880_s22 = scalar_lea.hbm %s1013_s1, %s462_s30  ;;  %s198_s23 = scalar_lea.vmem [#allocation5], %s461_s29 }
  0x34   : > { %p871_p7 = pnand %p1024_p2, %p1023_p1  ;;  %s206_s4 = sshll.u32 %s198_s23, 4  ;;  %s207_s4 = int_to_ptr.vmem [resolvable:$true] %s206_s4 }
  0x35   : > { %s195_s6 = scalar_lea.sflag [#allocation6], %s818_s28  ;;  %s579_s8 = scalar_lea.hbm %s880_s22, 128 }
  0x36   : > { %s1025_s11 = scalar_select %p871_p7, 1, 0 }
  0x37   : > { %p580_p9 = scmp.ne.s32.totalorder %s880_s22, %s579_s8  ;;  %s584_s30 = scalar_lea.hbm %s1013_s1, 256 }
  0x38   : > { %p585_p3 = scmp.lt.u32.totalorder %s880_s22, %s1013_s1  ;;  %p586_p6 = scmp.lt.u32.totalorder %s584_s30, %s579_s8 }
  0x39   : > { %p582_p11 = pnand %p580_p9, %p551_p5  ;;  %p588_p10 = scmp.lt.u32.totalorder %s579_s8, %s880_s22 }
  0x3a   : > { %p587_p4 = por %p586_p6, %p585_p3 }
  0x3b   : > { %p583_p13 = pneg %p582_p11 }
  0x3c   : > { %p589_p12 = por %p588_p10, %p587_p4 }
  0x3e   : > { %p590_p1 = pnand %p589_p12, %p583_p13 }
  0x40   : > { %593 = shalt.err (!%p590_p1)
}
  0x41   : > { %s594_s28 = scalar_lea.vmem %s207_s4, 128  ;;  %s730_s29 = smov [#allocation5]  }
  0x42   : > { %p595_p2 = scmp.ne.s32.totalorder %s207_s4, %s594_s28  ;;  %s599_s19 = sshll.u32 %s730_s29, 4  ;;  %s600_s19 = int_to_ptr.vmem [resolvable:$false] %s599_s19 }
  0x43   : > { %s601_s21 = scalar_lea.vmem %s600_s19, 256  ;;  %p602_p8 = scmp.lt.s32.totalorder %s207_s4, %s600_s19 }
  0x44   : > { %p597_p9 = pnand %p595_p2, %p551_p5  ;;  %p603_p7 = scmp.lt.s32.totalorder %s601_s21, %s594_s28 }
  0x46   : > { %p598_p11 = pneg %p597_p9  ;;  %p604_p3 = por %p603_p7, %p602_p8 }
  0x48   : > { %p605_p6 = pnand %p604_p3, %p598_p11 }
  0x4a   : > { %608 = shalt.err (!%p605_p6)
}
  0x4b   : > { %490 = dma.hbm_to_vmem [thread:$0]  (!%p835_p0), %s880_s22, 128, %s207_s4, %s195_s6  }
  0x4c   : > { %p1026_p13 = scmp.ne.s32.totalorder %s1025_s11, 0 }
  0x4d   : > { %s907_s23 = sand.u32 (!%p1026_p13), 1, %s711_s13   ;;  %p1027_p8 = scmp.ne.s32.totalorder (!%p1026_p13), %s1019_s24, 0 }
  0x4e   : > { %215 = sbr.rel (%p1026_p13) target bundleno = 138 (0x8a), region = 28  ;;  %s910_s8 = sshll.u32 (!%p1026_p13), %s907_s23, 3 }
  0x4f   : > { %s218_s10 = scalar_lea.sflag (!%p1026_p13), [#allocation3], %s907_s23  ;;  %s221_s5 = scalar_lea.vmem (!%p1026_p13), [#allocation2], %s910_s8 }
  0x55   : > { %690 = dma.done.wait (%p1027_p8), %s218_s10, 128  }
  0x56   : > { %692 = vsyncadd (%p1027_p8), %s218_s10, 4294967168  ;;  %s227_s9 = scalar_lea.sflag [#allocation6], %s907_s23  ;;  %s230_s11 = scalar_lea.vmem [#allocation5], %s910_s8 }
  0x57   : > { %694 = dma.done.wait (%p1027_p8), %s227_s9, 128  }
  0x58   : > { %696 = vsyncadd (%p1027_p8), %s227_s9, 4294967168  ;;  %v271_v0 = vld [vmem:[%s221_s5] sm:$0xff]  ;;  %v272_v1 = vld [vmem:[%s230_s11] sm:$0xff]  ;;  %s472_s22 = sshll.u32 %s719_s15, 7  ;;  %s255_s4 = scalar_lea.vmem [#allocation7], %s910_s8 }
  0x59   : > { %s303_s6 = sshll.u32 %s255_s4, 4  ;;  %v273_v2 = vmul.f32 %v272_v1, %v271_v0  ;;  %v274_v3 = vmul.f32 %v271_v0, %v271_v0  ;;  %v275_v4 = vmul.f32 %v272_v1, %v272_v1  ;;  %s262_s30 = scalar_lea.vmem [#allocation8], %s910_s8  ;;  %s934_s6 = int_to_ptr.vmem [resolvable:$true] %s303_s6 }
  0x5a   : > { %s317_s7 = sshll.u32 %s262_s30, 4  ;;  %s932_s28 = scalar_lea.hbm %s1014_s2, %s472_s22  ;;  %s941_s7 = int_to_ptr.vmem [resolvable:$true] %s317_s7 }
  0x5b   : > { %v276_v5 = vadd.f32 %v275_v4, %v274_v3  ;;  %279 = vst [vmem:[%s255_s4] sm:$0xff] %v273_v2  ;;  %s939_s19 = scalar_lea.hbm %s1015_s3, %s472_s22  ;;  %s284_s21 = scalar_lea.sflag [#allocation4], %s907_s23 }
  0x5c   : > { %s609_s10 = scalar_lea.vmem %s934_s6, 128  ;;  %p1028_p5 = scmp.ne.s32.totalorder %s1020_s25, 0 }
  0x5d   : > { %p610_p0 = scmp.ne.s32.totalorder %s934_s6, %s609_s10  ;;  %s731_s5 = smov [#allocation7]  }
  0x5e   : > { %s613_s9 = sshll.u32 %s731_s5, 4  ;;  %s614_s9 = int_to_ptr.vmem [resolvable:$false] %s613_s9 }
  0x5f   : > { %p611_p7 = pnand %p610_p0, %p1028_p5  ;;  %s615_s11 = scalar_lea.vmem %s614_s9, 256 }
  0x60   : > { %p616_p10 = scmp.lt.s32.totalorder %s934_s6, %s614_s9  ;;  %p617_p12 = scmp.lt.s32.totalorder %s615_s11, %s609_s10 }
  0x61   : > { %p612_p4 = pneg %p611_p7 }
  0x62   : > { %p618_p1 = por %p617_p12, %p616_p10 }
  0x64   : > { %p619_p2 = pnand %p618_p1, %p612_p4 }
  0x66   : > { %622 = shalt.err (!%p619_p2)
}
  0x67   : > { %s623_s22 = scalar_lea.hbm %s932_s28, 128  ;;  %s627_s18 = scalar_lea.hbm %s1014_s2, 256 }
  0x68   : > { %p624_p9 = scmp.ne.s32.totalorder %s932_s28, %s623_s22  ;;  %p628_p6 = scmp.lt.u32.totalorder %s932_s28, %s1014_s2 }
  0x69   : > { %p629_p13 = scmp.lt.u32.totalorder %s627_s18, %s623_s22  ;;  %p631_p0 = scmp.lt.u32.totalorder %s623_s22, %s932_s28 }
  0x6a   : > { %p625_p11 = pnand %p624_p9, %p1028_p5 }
  0x6b   : > { %p630_p8 = por %p629_p13, %p628_p6 }
  0x6c   : > { %p626_p3 = pneg %p625_p11 }
  0x6d   : > { %p632_p7 = por %p631_p0, %p630_p8 }
  0x6f   : > { %p633_p4 = pnand %p632_p7, %p626_p3 }
  0x71   : > { %636 = shalt.err (!%p633_p4)
}
  0x72   : > { %480 = dma.vmem_to_hbm [thread:$0]  (%p1028_p5), %s934_s6, 128, %s932_s28, %s284_s21   ;;  %282 = vst [vmem:[%s262_s30] sm:$0xff] %v276_v5 }
  0x73   : > { %s289_s10 = scalar_lea.sflag [#allocation9], %s907_s23  ;;  %s637_s5 = scalar_lea.vmem %s941_s7, 128 }
  0x74   : > { %p638_p10 = scmp.ne.s32.totalorder %s941_s7, %s637_s5  ;;  %s732_s9 = smov [#allocation8]  }
  0x75   : > { %s641_s11 = sshll.u32 %s732_s9, 4  ;;  %s642_s11 = int_to_ptr.vmem [resolvable:$false] %s641_s11 }
  0x76   : > { %p639_p12 = pnand %p638_p10, %p1028_p5  ;;  %s643_s22 = scalar_lea.vmem %s642_s11, 256 }
  0x77   : > { %p644_p2 = scmp.lt.s32.totalorder %s941_s7, %s642_s11  ;;  %p645_p9 = scmp.lt.s32.totalorder %s643_s22, %s637_s5 }
  0x78   : > { %p640_p1 = pneg %p639_p12 }
  0x79   : > { %p646_p11 = por %p645_p9, %p644_p2 }
  0x7b   : > { %p647_p3 = pnand %p646_p11, %p640_p1 }
  0x7d   : > { %650 = shalt.err (!%p647_p3)
}
  0x7e   : > { %s651_s23 = scalar_lea.hbm %s939_s19, 128  ;;  %s655_s30 = scalar_lea.hbm %s1015_s3, 256 }
  0x7f   : > { %p652_p6 = scmp.ne.s32.totalorder %s939_s19, %s651_s23  ;;  %p656_p0 = scmp.lt.u32.totalorder %s939_s19, %s1015_s3 }
  0x80   : > { %p657_p7 = scmp.lt.u32.totalorder %s655_s30, %s651_s23  ;;  %p659_p10 = scmp.lt.u32.totalorder %s651_s23, %s939_s19 }
  0x81   : > { %p653_p13 = pnand %p652_p6, %p1028_p5 }
  0x82   : > { %p658_p4 = por %p657_p7, %p656_p0 }
  0x83   : > { %p654_p8 = pneg %p653_p13 }
  0x84   : > { %p660_p12 = por %p659_p10, %p658_p4 }
  0x86   : > { %p661_p1 = pnand %p660_p12, %p654_p8 }
  0x88   : > { %664 = shalt.err (!%p661_p1)
}
  0x89   : > { %481 = dma.vmem_to_hbm [thread:$0]  (%p1028_p5), %s941_s7, 128, %s939_s19, %s289_s10  }
  0x8a PF: > { %s329_s4 = sand.u32 1, %s707_s12   ;;  %p1029_p2 = scmp.ne.s32.totalorder %s1021_s27, 0 }
  0x8b   : > { %p1030_p9 = scmp.ge.s32.totalorder %s727_s17, 2  ;;  %s330_s24 = scalar_lea.sflag [#allocation4], %s329_s4 }
  0x8d   : > { %p492_p11 = pnand %p1030_p9, %p1029_p2 }
  0x8f   : > { %698 = dma.done.wait (!%p492_p11), %s330_s24, 128  }
  0x90   : > { %700 = vsyncadd (!%p492_p11), %s330_s24, 4294967168  ;;  %s339_s18 = scalar_lea.sflag [#allocation9], %s329_s4 }
  0x91   : > { %702 = dma.done.wait (!%p492_p11), %s339_s18, 128  }
  0x92   : > { %704 = vsyncadd (!%p492_p11), %s339_s18, 4294967168  ;;  %s26_s17 = sadd.s32 1, %s727_s17   ;;  %s1031_s12 = smov %s711_s13 }
  0x93   : > { %p23_p3 = scmp.ge.s32.totalorder %s26_s17, 4   ;;  %s1032_s13 = smov %s715_s14 }
  0x94   : > { %s1033_s14 = smov %s809_s26  ;;  %s1034_s15 = smov %s723_s16 }
  0x95   : > { %s1035_s16 = smov %s1037_s20  ;;  %25 = sbr.rel (!%p23_p3) target bundleno = 10 (0xa), region = 107 }
  0x9c   :  { %344 = vsyncpa [#allocation3], 1 }
  0x9d   :  { %346 = vsyncpa [#allocation3 + $0x1], 1 }
  0x9e   :  { %347 = vsyncpa [#allocation6], 1 }
  0x9f   :  { %349 = vsyncpa [#allocation6 + $0x1], 1 }
  0xa0   :  { %350 = vsyncpa [#allocation4], 1 }
  0xa1   :  { %352 = vsyncpa [#allocation4 + $0x1], 1 }
  0xa2   :  { %353 = vsyncpa [#allocation9], 1 }
  0xa3   :  { %355 = vsyncpa [#allocation9 + $0x1], 1 }

</bundles_post_ra>
